<compile_context>
chip_gen: v5e
topology: v5e:2x2
jax: 0.10.0
libtpu: 0.0.40
codegen_flags: <defaults>
</compile_context>

<pallas_src>
import functools
import math

import jax
import jax.numpy as jnp
from jax import lax
from jax.experimental import pallas as pl
from jax.experimental.pallas import tpu as pltpu

TEMPERATURE = 0.1
INV_SQRT_T = (1.0 / TEMPERATURE) ** 0.5
EPS_SQ = 1e-8          # clamp on the squared row norm
NEG_INF = -1e30


def ntxent_kernel(*refs, tile_rows, tile_cols, batch, n2b, padded, resident):
    if resident:
        reps_ref, out_ref, m_sc, l_sc, pos_sc = refs
    else:
        rows_ref, cols_ref, out_ref, m_sc, l_sc, pos_sc = refs

    ri = pl.program_id(0)
    ci = pl.program_id(1)
    row_start = ri * tile_rows
    col_start = ci * tile_cols

    # ---- per-row-tile init of the online-LSE / positive accumulators ----
    @pl.when(ci == 0)
    def _init():
        m_sc[...] = jnp.full_like(m_sc, NEG_INF)
        l_sc[...] = jnp.zeros_like(l_sc)
        pos_sc[...] = jnp.zeros_like(pos_sc)

    if resident:
        # Whole normalized reps is VMEM-resident: slice both operands from it.
        rows = reps_ref[pl.ds(pl.multiple_of(row_start, tile_rows), tile_rows), :]
        cols = reps_ref[pl.ds(pl.multiple_of(col_start, tile_cols), tile_cols), :]
    else:
        rows = rows_ref[...]
        cols = cols_ref[...]

    # logits tile = rows @ cols^T: already sim / T because 1/sqrt(T) was folded
    # into the normalized operands in the wrapper.  Contract the feature dims
    # directly (no transpose pass through the XLU); accumulate in f32.
    logits = lax.dot_general(rows, cols, (((1,), (1,)), ((), ())),
                             preferred_element_type=jnp.float32)   # (Tr, Tc)

    gr = lax.broadcasted_iota(jnp.int32, (tile_rows, 1), 0) + row_start
    gc = lax.broadcasted_iota(jnp.int32, (1, tile_cols), 1) + col_start

    # ---- self-similarity mask, gated to tiles containing diagonal entries ----
    has_diag = jnp.logical_and(row_start < col_start + tile_cols,
                               col_start < row_start + tile_rows)
    masked = lax.cond(has_diag,
                      lambda lg: jnp.where(gr == gc, NEG_INF, lg),
                      lambda lg: lg,
                      logits)
    if padded != n2b:            # static: only in the ragged / padded case
        masked = jnp.where(gc >= n2b, NEG_INF, masked)

    # ---- online log-sum-exp across column tiles (f32) ----
    m_prev = m_sc[...]
    m_new = jnp.maximum(m_prev, jnp.max(masked, axis=-1, keepdims=True))
    alpha = jnp.exp(m_prev - m_new)
    l_sc[...] = alpha * l_sc[...] + jnp.sum(jnp.exp(masked - m_new),
                                            axis=-1, keepdims=True)
    m_sc[...] = m_new

    # ---- positive logit: sim[i, (i+B) % 2B] / T.  Partners of this row tile
    # ---- lie in at most two contiguous column ranges; run the select+reduce
    # ---- only on column tiles overlapping them, accumulating with '+='.
    col_end = col_start + tile_cols
    lo_a = row_start + batch                                   # rows < B
    hi_a = jnp.minimum(row_start + tile_rows, batch) + batch
    lo_b = jnp.maximum(row_start, batch) - batch               # rows >= B
    hi_b = row_start + tile_rows - batch

    def _overlaps(lo, hi):
        return jnp.logical_and(lo < hi,
                               jnp.logical_and(lo < col_end, col_start < hi))

    @pl.when(jnp.logical_or(_overlaps(lo_a, hi_a), _overlaps(lo_b, hi_b)))
    def _pos():
        partner = jnp.where(gr < batch, gr + batch, gr - batch)   # (Tr, 1)
        pos_sc[...] += jnp.sum(jnp.where(gc == partner, logits, 0.0),
                               axis=-1, keepdims=True)

    # ---- finalize: per-row CE_i = logsumexp_{j != i} - positive_i ----
    @pl.when(ci == pl.num_programs(1) - 1)
    def _fin():
        out_ref[...] = m_sc[...] + jnp.log(l_sc[...]) - pos_sc[...]


def _round_up(x, m):
    return -(-x // m) * m


def _vmem_budget_bytes():
    """Usable VMEM budget for this kernel's buffers, derived from the chip."""
    try:
        cap = int(pltpu.get_tpu_info().vmem_capacity_bytes)
    except Exception:
        cap = 64 * 1024 * 1024     # assume the smallest (v7x per-core) VMEM
    return min(cap * 3 // 4, 100 * 1024 * 1024)


def _plan(n2b, d, itemsize, budget, tile_rows=None, tile_cols=None,
          resident=None):
    """Pick (tile_rows, tile_cols, padded_n, resident, vmem_limit_bytes)."""
    def temporaries(tr, tc):
        # (Tr, Tc) f32 logits/mask/exp intermediates + per-row f32 vectors.
        return 8 * tr * tc * 4 + 8 * tr * 4

    def need_streaming(tr, tc):
        return 2 * (tr + tc) * d * itemsize + temporaries(tr, tc)

    def need_resident(padded, tr, tc):
        return 2 * padded * d * itemsize + temporaries(tr, tc)

    if tile_rows is not None or tile_cols is not None:
        tr = tile_rows if tile_rows is not None else tile_cols
        tc = tile_cols if tile_cols is not None else tile_rows
        padded = _round_up(n2b, (tr * tc) // math.gcd(tr, tc))
    else:
        padded8 = max(8, _round_up(n2b, 8))
        if padded8 <= 512:
            tr = tc = padded = padded8           # whole problem, one tile
        else:
            tc = 256                              # feeds the 256x256 MXU
            padded = _round_up(n2b, tc)
            tr = tc
            for cand in (1024, 512):              # largest row tile that fits
                if (cand <= padded and padded % cand == 0
                        and need_streaming(cand, tc) <= budget):
                    tr = cand
                    break
        # TODO(synk): also tile the feature dim when D alone overflows VMEM.

    if resident is None:
        resident = need_resident(padded, tr, tc) <= budget
    vmem_need = need_resident(padded, tr, tc) if resident else need_streaming(tr, tc)
    vmem_limit = int(min(budget, max(32 * 1024 * 1024, 2 * vmem_need)))
    return tr, tc, padded, resident, vmem_limit


def ntxent_loss(x1, x2, *, compute_dtype=jnp.bfloat16,
                tile_rows=None, tile_cols=None, resident=None):
    """x1, x2: (B, D) arrays.  Returns the scalar NT-Xent loss (float32)."""
    b, d = x1.shape
    n2b = 2 * b

    # One-shot prep in XLA: concat, L2-normalize, fold 1/sqrt(T), cast.
    reps = jnp.concatenate([x2, x1], axis=0).astype(jnp.float32)
    sq = jnp.sum(reps * reps, axis=-1, keepdims=True)
    reps_hat = (reps * lax.rsqrt(jnp.maximum(sq, EPS_SQ)) * INV_SQRT_T
                ).astype(compute_dtype)

    itemsize = jnp.dtype(compute_dtype).itemsize
    budget = _vmem_budget_bytes()
    tr, tc, padded, res, vmem_limit = _plan(
        n2b, d, itemsize, budget, tile_rows, tile_cols, resident)

    if padded != n2b:
        reps_hat = jnp.pad(reps_hat, ((0, padded - n2b), (0, 0)))

    nr, nc = padded // tr, padded // tc

    kernel = functools.partial(ntxent_kernel, tile_rows=tr, tile_cols=tc,
                               batch=b, n2b=n2b, padded=padded, resident=res)

    if res:
        # Whole reps stays VMEM-resident (constant block index -> fetched once).
        in_specs = [pl.BlockSpec((padded, d), lambda ri, ci: (0, 0))]
        operands = (reps_hat,)
    else:
        in_specs = [pl.BlockSpec((tr, d), lambda ri, ci: (ri, 0)),   # row block
                    pl.BlockSpec((tc, d), lambda ri, ci: (ci, 0))]   # col block
        operands = (reps_hat, reps_hat)

    col_passes = 1 if res else nr
    per_row = pl.pallas_call(
        kernel,
        out_shape=jax.ShapeDtypeStruct((padded, 1), jnp.float32),
        grid_spec=pltpu.PrefetchScalarGridSpec(
            num_scalar_prefetch=0,
            grid=(nr, nc),
            in_specs=in_specs,
            out_specs=pl.BlockSpec((tr, 1), lambda ri, ci: (ri, 0)),
            scratch_shapes=[
                pltpu.VMEM((tr, 1), jnp.float32),   # running max
                pltpu.VMEM((tr, 1), jnp.float32),   # running sum-exp
                pltpu.VMEM((tr, 1), jnp.float32),   # positive logit
            ]),
        compiler_params=pltpu.CompilerParams(
            dimension_semantics=("parallel", "arbitrary"),
            vmem_limit_bytes=vmem_limit),
        cost_estimate=pl.CostEstimate(
            flops=2 * padded * padded * d,
            transcendentals=padded * padded,
            bytes_accessed=(1 + col_passes) * padded * d * itemsize + padded * 4),
    )(*operands)

    return jnp.sum(per_row[:n2b, 0]) / jnp.float32(n2b)


def ntxent_loss_ref(x1, x2):
    """Pure-JAX reference mirroring the PyTorch module."""
    b = x1.shape[0]
    reps = jnp.concatenate([x2, x1], axis=0).astype(jnp.float32)
    n = jnp.linalg.norm(reps, axis=-1, keepdims=True)
    sim = (reps @ reps.T) / jnp.maximum(n * n.T, 1e-8)
    n2b = 2 * b
    logits = sim / TEMPERATURE
    row = jnp.arange(n2b)[:, None]
    col = jnp.arange(n2b)[None, :]
    masked = jnp.where(row == col, -1e30, logits)
    lse = jax.scipy.special.logsumexp(masked, axis=-1)
    pos = logits[jnp.arange(n2b), (jnp.arange(n2b) + b) % n2b]
    return jnp.sum(lse - pos) / n2b


if __name__ == "__main__":
    key = jax.random.PRNGKey(0)
    k1, k2, k3, k4, k5, k6 = jax.random.split(key, 6)

    # 1) Small case consistent with the module (B=4, D=32): single resident
    #    tile, f32 operands, tight tolerance.
    B, D = 4, 32
    x1 = jax.random.normal(k1, (B, D), dtype=jnp.float32)
    x2 = jax.random.normal(k2, (B, D), dtype=jnp.float32)
    ref = jax.block_until_ready(ntxent_loss_ref(x1, x2))
    out = jax.block_until_ready(ntxent_loss(x1, x2, compute_dtype=jnp.float32))
    assert bool(jnp.isfinite(out)), "non-finite loss (small case)"
    assert abs(float(out) - float(ref)) < 1e-4 * max(1.0, abs(float(ref))), (
        f"small-case mismatch: kernel={float(out)} ref={float(ref)}")

    # 2) Multi-tile paths at B=64, D=128 (2B=128).
    B2, D2 = 64, 128
    y1 = jax.random.normal(k3, (B2, D2), dtype=jnp.float32)
    y2 = jax.random.normal(k4, (B2, D2), dtype=jnp.float32)
    ref2 = jax.block_until_ready(ntxent_loss_ref(y1, y2))

    # 2a) streamed square tiles, grid (2,2): online LSE + gated pos/diag tiles.
    out_f32 = jax.block_until_ready(ntxent_loss(
        y1, y2, compute_dtype=jnp.float32,
        tile_rows=64, tile_cols=64, resident=False))
    out_bf16 = jax.block_until_ready(ntxent_loss(
        y1, y2, compute_dtype=jnp.bfloat16,
        tile_rows=64, tile_cols=64, resident=False))
    assert bool(jnp.isfinite(out_f32)) and bool(jnp.isfinite(out_bf16))
    assert abs(float(out_f32) - float(ref2)) < 1e-4 * max(1.0, abs(float(ref2))), (
        f"streamed f32 mismatch: kernel={float(out_f32)} ref={float(ref2)}")
    assert abs(float(out_bf16) - float(ref2)) < 2e-2 * max(1.0, abs(float(ref2))), (
        f"streamed bf16 mismatch: kernel={float(out_bf16)} ref={float(ref2)}")

    # 2b) resident reps, rectangular tiles (Tr=128, Tc=64), grid (1,2):
    #     exercises pl.ds slicing and '+=' positive accumulation across tiles.
    out_res = jax.block_until_ready(ntxent_loss(
        y1, y2, compute_dtype=jnp.float32,
        tile_rows=128, tile_cols=64, resident=True))
    assert bool(jnp.isfinite(out_res))
    assert abs(float(out_res) - float(ref2)) < 1e-4 * max(1.0, abs(float(ref2))), (
        f"resident f32 mismatch: kernel={float(out_res)} ref={float(ref2)}")

    # 3) Ragged batch (B=5 -> 2B=10, padded to 16): exercises the padding mask.
    B3, D3 = 5, 32
    z1 = jax.random.normal(k5, (B3, D3), dtype=jnp.float32)
    z2 = jax.random.normal(k6, (B3, D3), dtype=jnp.float32)
    ref3 = jax.block_until_ready(ntxent_loss_ref(z1, z2))
    out3 = jax.block_until_ready(ntxent_loss(z1, z2, compute_dtype=jnp.float32))
    assert bool(jnp.isfinite(out3)), "non-finite loss (ragged case)"
    assert abs(float(out3) - float(ref3)) < 1e-4 * max(1.0, abs(float(ref3))), (
        f"ragged mismatch: kernel={float(out3)} ref={float(ref3)}")

    print("KERNEL_OK")
</pallas_src>

<mosaic_0001>
module attributes {stable_mosaic.version = 11 : i64} {
  func.func @ntxent_kernel(%arg0: i32, %arg1: i32, %arg2: memref<8x32xf32, #tpu.memory_space<vmem>>, %arg3: memref<8x1xf32, #tpu.memory_space<vmem>>, %arg4: memref<8x1xf32, #tpu.memory_space<vmem>>, %arg5: memref<8x1xf32, #tpu.memory_space<vmem>>, %arg6: memref<8x1xf32, #tpu.memory_space<vmem>>) attributes {dimension_semantics = [#tpu.dimension_semantics<parallel>, #tpu.dimension_semantics<arbitrary>], iteration_bounds = array<i64: 1, 1>, scalar_prefetch = 0 : i64, scratch_operands = 3 : i64, tpu.core_type = #tpu.core_type<tc>, window_params = [{pipeline_mode = #tpu.pipeline_mode<synchronous>, transform_indices = @transform_0, window_bounds = array<i64: 8, 32>}, {transform_indices = @transform_1, window_bounds = array<i64: 8, 1>}]} {
    %c8_i32 = arith.constant 8 : i32
    %0 = arith.muli %arg0, %c8_i32 : i32
    %c8_i32_0 = arith.constant 8 : i32
    %1 = arith.muli %arg1, %c8_i32_0 : i32
    %c0_i32 = arith.constant 0 : i32
    %2 = arith.cmpi eq, %arg1, %c0_i32 : i32
    %3 = arith.extui %2 : i1 to i32
    %c0_i32_1 = arith.constant 0 : i32
    %4 = arith.cmpi ne, %3, %c0_i32_1 : i32
    scf.if %4 {
      %cst_27 = arith.constant -1.000000e+30 : f32
      %67 = vector.broadcast %cst_27 : f32 to vector<8x1xf32>
      %c0_28 = arith.constant 0 : index
      %c0_29 = arith.constant 0 : index
      %68 = vector.load %arg4[%c0_28, %c0_29] : memref<8x1xf32, #tpu.memory_space<vmem>>, vector<8x1xf32>
      tpu.vector_store %arg4[%c0_28, %c0_29], %67 {strides = array<i32>} : memref<8x1xf32, #tpu.memory_space<vmem>>, vector<8x1xf32>,
      %cst_30 = arith.constant 0.000000e+00 : f32
      %69 = vector.broadcast %cst_30 : f32 to vector<8x1xf32>
      %c0_31 = arith.constant 0 : index
      %c0_32 = arith.constant 0 : index
      %70 = vector.load %arg5[%c0_31, %c0_32] : memref<8x1xf32, #tpu.memory_space<vmem>>, vector<8x1xf32>
      tpu.vector_store %arg5[%c0_31, %c0_32], %69 {strides = array<i32>} : memref<8x1xf32, #tpu.memory_space<vmem>>, vector<8x1xf32>,
      %cst_33 = arith.constant 0.000000e+00 : f32
      %71 = vector.broadcast %cst_33 : f32 to vector<8x1xf32>
      %c0_34 = arith.constant 0 : index
      %c0_35 = arith.constant 0 : index
      %72 = vector.load %arg6[%c0_34, %c0_35] : memref<8x1xf32, #tpu.memory_space<vmem>>, vector<8x1xf32>
      tpu.vector_store %arg6[%c0_34, %c0_35], %71 {strides = array<i32>} : memref<8x1xf32, #tpu.memory_space<vmem>>, vector<8x1xf32>,
    } else {
    }
    %5 = tpu.assume_multiple %0, 8 : i32
    %6 = arith.index_cast %5 : i32 to index
    %c0 = arith.constant 0 : index
    %7 = vector.load %arg2[%6, %c0] : memref<8x32xf32, #tpu.memory_space<vmem>>, vector<8x32xf32>
    %8 = tpu.assume_multiple %1, 8 : i32
    %9 = arith.index_cast %8 : i32 to index
    %c0_2 = arith.constant 0 : index
    %10 = vector.load %arg2[%9, %c0_2] : memref<8x32xf32, #tpu.memory_space<vmem>>, vector<8x32xf32>
    %cst = arith.constant dense<0.000000e+00> : vector<8x8xf32>
    %11 = tpu.matmul %7, %10, %cst {dimension_numbers = #tpu.dot_dimension_numbers<[1], [1], [0], [0], [0, 0, 1, 0], [], []>} : vector<8x32xf32>, vector<8x32xf32>, vector<8x8xf32> -> vector<8x8xf32>
    %12 = tpu.iota {dimensions = array<i32: 0>} : vector<8x1xi32>
    %13 = vector.broadcast %0 : i32 to vector<8x1xi32>
    %14 = arith.addi %12, %13 : vector<8x1xi32>
    %15 = tpu.iota {dimensions = array<i32: 1>} : vector<1x8xi32>
    %16 = vector.broadcast %1 : i32 to vector<1x8xi32>
    %17 = arith.addi %15, %16 : vector<1x8xi32>
    %c8_i32_3 = arith.constant 8 : i32
    %18 = arith.addi %1, %c8_i32_3 : i32
    %19 = arith.cmpi slt, %0, %18 : i32
    %c8_i32_4 = arith.constant 8 : i32
    %20 = arith.addi %0, %c8_i32_4 : i32
    %21 = arith.cmpi slt, %1, %20 : i32
    %22 = arith.andi %19, %21 : i1
    %23 = arith.extui %22 : i1 to i32
    %c0_i32_5 = arith.constant 0 : i32
    %24 = arith.cmpi ne, %23, %c0_i32_5 : i32
    %25 = scf.if %24 -> (vector<8x8xf32>) {
      %67 = vector.broadcast %14 : vector<8x1xi32> to vector<8x8xi32>
      %68 = vector.broadcast %17 : vector<1x8xi32> to vector<8x8xi32>
      %69 = arith.cmpi eq, %67, %68 : vector<8x8xi32>
      %cst_27 = arith.constant -1.000000e+30 : f32
      %70 = vector.broadcast %cst_27 : f32 to vector<8x8xf32>
      %71 = arith.select %69, %70, %11 : vector<8x8xi1>, vector<8x8xf32>
      scf.yield %71 : vector<8x8xf32>
    } else {
      scf.yield %11 : vector<8x8xf32>
    }
    %c0_6 = arith.constant 0 : index
    %c0_7 = arith.constant 0 : index
    %26 = vector.load %arg4[%c0_6, %c0_7] : memref<8x1xf32, #tpu.memory_space<vmem>>, vector<8x1xf32>
    %cst_8 = arith.constant dense<0xFF800000> : vector<8xf32>
    %27 = vector.multi_reduction <maximumf>, %25, %cst_8 [1] : vector<8x8xf32> to vector<8xf32>
    %28 = vector.shape_cast %27 : vector<8xf32> to vector<8x1xf32>
    %29 = arith.maximumf %26, %28 : vector<8x1xf32>
    %30 = arith.subf %26, %29 : vector<8x1xf32>
    %31 = math.exp %30 : vector<8x1xf32>
    %c0_9 = arith.constant 0 : index
    %c0_10 = arith.constant 0 : index
    %32 = vector.load %arg5[%c0_9, %c0_10] : memref<8x1xf32, #tpu.memory_space<vmem>>, vector<8x1xf32>
    %33 = arith.mulf %31, %32 : vector<8x1xf32>
    %34 = vector.broadcast %29 : vector<8x1xf32> to vector<8x8xf32>
    %35 = arith.subf %25, %34 : vector<8x8xf32>
    %36 = math.exp %35 : vector<8x8xf32>
    %cst_11 = arith.constant dense<0.000000e+00> : vector<8xf32>
    %37 = vector.multi_reduction <add>, %36, %cst_11 [1] : vector<8x8xf32> to vector<8xf32>
    %38 = vector.shape_cast %37 : vector<8xf32> to vector<8x1xf32>
    %39 = arith.addf %33, %38 : vector<8x1xf32>
    %c0_12 = arith.constant 0 : index
    %c0_13 = arith.constant 0 : index
    %40 = vector.load %arg5[%c0_12, %c0_13] : memref<8x1xf32, #tpu.memory_space<vmem>>, vector<8x1xf32>
    tpu.vector_store %arg5[%c0_12, %c0_13], %39 {strides = array<i32>} : memref<8x1xf32, #tpu.memory_space<vmem>>, vector<8x1xf32>,
    %c0_14 = arith.constant 0 : index
    %c0_15 = arith.constant 0 : index
    %41 = vector.load %arg4[%c0_14, %c0_15] : memref<8x1xf32, #tpu.memory_space<vmem>>, vector<8x1xf32>
    tpu.vector_store %arg4[%c0_14, %c0_15], %29 {strides = array<i32>} : memref<8x1xf32, #tpu.memory_space<vmem>>, vector<8x1xf32>,
    %c8_i32_16 = arith.constant 8 : i32
    %42 = arith.addi %1, %c8_i32_16 : i32
    %c4_i32 = arith.constant 4 : i32
    %43 = arith.addi %0, %c4_i32 : i32
    %c8_i32_17 = arith.constant 8 : i32
    %44 = arith.addi %0, %c8_i32_17 : i32
    %c4_i32_18 = arith.constant 4 : i32
    %45 = arith.minsi %44, %c4_i32_18 : i32
    %c4_i32_19 = arith.constant 4 : i32
    %46 = arith.addi %45, %c4_i32_19 : i32
    %c4_i32_20 = arith.constant 4 : i32
    %47 = arith.maxsi %0, %c4_i32_20 : i32
    %c4_i32_21 = arith.constant 4 : i32
    %48 = arith.subi %47, %c4_i32_21 : i32
    %c8_i32_22 = arith.constant 8 : i32
    %49 = arith.addi %0, %c8_i32_22 : i32
    %c4_i32_23 = arith.constant 4 : i32
    %50 = arith.subi %49, %c4_i32_23 : i32
    %51 = arith.cmpi slt, %43, %46 : i32
    %52 = arith.cmpi slt, %43, %42 : i32
    %53 = arith.cmpi slt, %1, %46 : i32
    %54 = arith.andi %52, %53 : i1
    %55 = arith.andi %51, %54 : i1
    %56 = arith.cmpi slt, %48, %50 : i32
    %57 = arith.cmpi slt, %48, %42 : i32
    %58 = arith.cmpi slt, %1, %50 : i32
    %59 = arith.andi %57, %58 : i1
    %60 = arith.andi %56, %59 : i1
    %61 = arith.ori %55, %60 : i1
    %62 = arith.extui %61 : i1 to i32
    %c0_i32_24 = arith.constant 0 : i32
    %63 = arith.cmpi ne, %62, %c0_i32_24 : i32
    scf.if %63 {
      %c4_i32_27 = arith.constant 4 : i32
      %67 = vector.broadcast %c4_i32_27 : i32 to vector<8x1xi32>
      %68 = arith.cmpi slt, %14, %67 : vector<8x1xi32>
      %c4_i32_28 = arith.constant 4 : i32
      %69 = vector.broadcast %c4_i32_28 : i32 to vector<8x1xi32>
      %70 = arith.addi %14, %69 : vector<8x1xi32>
      %c4_i32_29 = arith.constant 4 : i32
      %71 = vector.broadcast %c4_i32_29 : i32 to vector<8x1xi32>
      %72 = arith.subi %14, %71 : vector<8x1xi32>
      %73 = arith.select %68, %70, %72 : vector<8x1xi1>, vector<8x1xi32>
      %c0_30 = arith.constant 0 : index
      %c0_31 = arith.constant 0 : index
      %74 = vector.load %arg6[%c0_30, %c0_31] : memref<8x1xf32, #tpu.memory_space<vmem>>, vector<8x1xf32>
      %75 = vector.broadcast %17 : vector<1x8xi32> to vector<8x8xi32>
      %76 = vector.broadcast %73 : vector<8x1xi32> to vector<8x8xi32>
      %77 = arith.cmpi eq, %75, %76 : vector<8x8xi32>
      %cst_32 = arith.constant 0.000000e+00 : f32
      %78 = vector.broadcast %cst_32 : f32 to vector<8x8xf32>
      %79 = arith.select %77, %11, %78 : vector<8x8xi1>, vector<8x8xf32>
      %cst_33 = arith.constant dense<0.000000e+00> : vector<8xf32>
      %80 = vector.multi_reduction <add>, %79, %cst_33 [1] : vector<8x8xf32> to vector<8xf32>
      %81 = vector.shape_cast %80 : vector<8xf32> to vector<8x1xf32>
      %82 = arith.addf %74, %81 : vector<8x1xf32>
      %c0_34 = arith.constant 0 : index
      %c0_35 = arith.constant 0 : index
      %83 = vector.load %arg6[%c0_34, %c0_35] : memref<8x1xf32, #tpu.memory_space<vmem>>, vector<8x1xf32>
      tpu.vector_store %arg6[%c0_34, %c0_35], %82 {strides = array<i32>} : memref<8x1xf32, #tpu.memory_space<vmem>>, vector<8x1xf32>,
    } else {
    }
    %c0_i32_25 = arith.constant 0 : i32
    %64 = arith.cmpi eq, %arg1, %c0_i32_25 : i32
    %65 = arith.extui %64 : i1 to i32
    %c0_i32_26 = arith.constant 0 : i32
    %66 = arith.cmpi ne, %65, %c0_i32_26 : i32
    scf.if %66 {
      %c0_27 = arith.constant 0 : index
      %c0_28 = arith.constant 0 : index
      %67 = vector.load %arg4[%c0_27, %c0_28] : memref<8x1xf32, #tpu.memory_space<vmem>>, vector<8x1xf32>
      %c0_29 = arith.constant 0 : index
      %c0_30 = arith.constant 0 : index
      %68 = vector.load %arg5[%c0_29, %c0_30] : memref<8x1xf32, #tpu.memory_space<vmem>>, vector<8x1xf32>
      %69 = math.log %68 : vector<8x1xf32>
      %70 = arith.addf %67, %69 : vector<8x1xf32>
      %c0_31 = arith.constant 0 : index
      %c0_32 = arith.constant 0 : index
      %71 = vector.load %arg6[%c0_31, %c0_32] : memref<8x1xf32, #tpu.memory_space<vmem>>, vector<8x1xf32>
      %72 = arith.subf %70, %71 : vector<8x1xf32>
      %c0_33 = arith.constant 0 : index
      %c0_34 = arith.constant 0 : index
      %73 = vector.load %arg3[%c0_33, %c0_34] : memref<8x1xf32, #tpu.memory_space<vmem>>, vector<8x1xf32>
      tpu.vector_store %arg3[%c0_33, %c0_34], %72 {strides = array<i32>} : memref<8x1xf32, #tpu.memory_space<vmem>>, vector<8x1xf32>,
    } else {
    }
    return
  }
  func.func @transform_0(%arg0: i32, %arg1: i32) -> (i32, i32) {
    %c0_i32 = arith.constant 0 : i32
    %c0_i32_0 = arith.constant 0 : i32
    %c0_i32_1 = arith.constant 0 : i32
    return %c0_i32, %c0_i32_0 : i32, i32
  }
  func.func @transform_1(%arg0: i32, %arg1: i32) -> (i32, i32) {
    %c0_i32 = arith.constant 0 : i32
    %c0_i32_0 = arith.constant 0 : i32
    return %arg0, %c0_i32 : i32, i32
  }
}

</mosaic_0001>

<bundles_post_ra>
// kernel: tpu_custom_call.1
= control target key start
LH: loop header
LB: loop body
LE: loop exit
PB: predicated region body
PF: predicated region fallthrough
CT: control target
= control target key end

     0   :  { %6 = vsyncpa [#allocation6], 0  ;;  %s205_s9 = smov [#allocation5]   ;;  %s235_s0 = inlined_call_operand.hbm [shape: f32[8,32], index: 0, kind: input, shape index: {}]   ;;  %s236_s1 = inlined_call_operand.vmem [shape: f32[8,1], index: 1, kind: output, shape index: {}]  }
   0x1   :  { %s12_s8 = sshll.u32 %s235_s0, 4  ;;  %s14_s10 = sshll.u32 %s205_s9, 4  ;;  %s13_s8 = int_to_ptr.hbm [resolvable:$true] %s12_s8  ;;  %s15_s10 = int_to_ptr.vmem [resolvable:$true] %s14_s10 }
   0x2   :  { %17 = dma.hbm_to_vmem [thread:$0]  %s13_s8, 128, %s15_s10, [#allocation6]  }
   0x3   :  { %203 = dma.done.wait [#allocation6], 128  }
   0x4   :  { %204 = vsyncadd [#allocation6], 4294967168  ;;  %vm36_vm0 = vcmask 261120   ;;  %v35_v0 = vld [vmem:[#allocation5] sm:$0xff]  ;;  %v63_v1 = vlaneseq  ;;  %vm28_vm3 = vcmask 7168   ;;  %vm87_vm5 = vcmask 64512  }
   0x5   :  { %165 = vmatpush.xpose.msk.msra.mxu0 %vm36_vm0, %v35_v0  ;;  %v206_v7 = vmov -1e+30   ;;  %v207_v12 = vmov 0   ;;  %v208_v13 = vmov 0.0  }
   0x6   :  { %v64_v2 = vshrl.u32 %v63_v1, 7  ;;  %v68_v5 = vand.u32 127, %v63_v1  ;;  %29 = vst.msk [vmem:[#allocation2] sm:$0xff] %vm28_vm3, %v206_v7  ;;  %172 = vset.pattern.permute.xlu0 %v207_v12 }
   0x7   :  { %30 = vst.msk [vmem:[#allocation3] sm:$0xff] %vm28_vm3, %v208_v13 }
   0x8   :  { %166 = vmatmul.msk.f32.vlgmr.msra.gmra.mxu0 %vm36_vm0, %v35_v0  ;;  %v138_v3 = vadd.s32 4, %v64_v2  ;;  %v167_v4 = vadd.s32 4294967292, %v64_v2  ;;  %vm137_vm1 = vcmp.lt.s32.totalorder %v64_v2, 4  ;;  %vm79_vm4 = vcmp.eq.s32.totalorder %v64_v2, %v68_v5  ;;  %31 = vst.msk [vmem:[#allocation4] sm:$0xff] %vm28_vm3, %v208_v13 }
   0xa   :  { %v140_v6 = vsel %vm137_vm1, %v138_v3, %v167_v4 }
   0xb   :  { %vm142_vm2 = vcmp.eq.s32.totalorder %v68_v5, %v140_v6 }
   0xd   :  { %v86_v14 = vld [vmem:[#allocation2] sm:$0xff] }
   0xe   :  { %v95_v26 = vld [vmem:[#allocation3] sm:$0xff] }
   0xf   :  { %v141_v30 = vld [vmem:[#allocation4] sm:$0xff] }
  0x85   :  { %v60_v8 = vpop.f32.mrf.mxu0 }
  0x86   :  { %v80_v9 = vsel %vm79_vm4, -1e+30, %v60_v8  ;;  %v143_v10 = vsel %vm142_vm2, %v60_v8, 0.0 }
  0x87   :  { %v88_v11 = vsel %vm87_vm5, %v80_v9, -inf  ;;  %v144_v23 = vsel %vm87_vm5, %v143_v10, 0.0 }
  0x88   :  { %89 = vmax.xlane.f32.xlu0 %v88_v11 }
  0xfb   :  { %v90_v15 = vpop.xlane.xlu0 %89 }
  0xfc   :  { %v91_v16 = vmax.f32 %v86_v14, %v90_v15 }
  0xfe   :  { %v92_v17 = vsub.f32 %v86_v14, %v91_v16  ;;  %111 = vst.msk [vmem:[#allocation2] sm:$0xff] %vm28_vm3, %v91_v16  ;;  %99 = vperm.xlu0 %172, %v91_v16  }
 0x100   :  { %v93_v24 = vmul.f32 1.442695, %v92_v17 }
 0x105   :  { %v152_v36 = vld [vmem:[#allocation2] sm:$0xff] }
 0x170   :  { %v100_v18 = vpop.permute.xlu0 %99 }
 0x171   :  { %v102_v19 = vsub.f32 %v80_v9, %v100_v18 }
 0x173   :  { %v103_v20 = vmul.f32 1.442695, %v102_v19 }
 0x175   :  { %173 = vpow2.f32 %v103_v20 }
 0x176   :  { %175 = vpow2.f32 %v93_v24 }
 0x17b   :  { %v174_v21 = vpop.eup %173 }
 0x17c   :  { %v105_v22 = vsel %vm87_vm5, %v174_v21, 0.0  ;;  %v176_v25 = vpop.eup %175 }
 0x17d   :  { %106 = vadd.xlane.f32.xlu1 %v105_v22  ;;  %v96_v27 = vmul.f32 %v176_v25, %v95_v26 }
 0x185   :  { %145 = vadd.xlane.f32.xlu1 %v144_v23 }
 0x1f0   :  { %v107_v28 = vpop.xlane.xlu1 %106 }
 0x1f1   :  { %v108_v29 = vadd.f32 %v107_v28, %v96_v27 }
 0x1f3   :  { %110 = vst.msk [vmem:[#allocation3] sm:$0xff] %vm28_vm3, %v108_v29 }
 0x1f8   :  { %v146_v31 = vpop.xlane.xlu1 %145 }
 0x1f9   :  { %v147_v32 = vadd.f32 %v146_v31, %v141_v30 }
 0x1fa   :  { %v153_v33 = vld [vmem:[#allocation3] sm:$0xff] }
 0x1fb   :  { %177 = vlog2.f32 %v153_v33  ;;  %148 = vst.msk [vmem:[#allocation4] sm:$0xff] %vm28_vm3, %v147_v32 }
 0x201   :  { %v178_v34 = vpop.eup %177 }
 0x202   :  { %v155_v35 = vmul.f32 0.6931472, %v178_v34  ;;  %v157_v38 = vld [vmem:[#allocation4] sm:$0xff] }
 0x204   :  { %v156_v37 = vadd.f32 %v155_v35, %v152_v36 }
 0x206   :  { %v158_v39 = vsub.f32 %v156_v37, %v157_v38 }
 0x208   :  { %159 = vst.msk [vmem:[%s236_s1] sm:$0xff] %vm28_vm3, %v158_v39 }
 0x209   :  { %164 = vsyncpa [#allocation6], 1 }

</bundles_post_ra>
